<compile_context>
chip_gen: v5e
topology: v5e:2x2
jax: 0.10.0
libtpu: 0.0.40
codegen_flags: <defaults>
</compile_context>

<pallas_src>
import jax
import jax.numpy as jnp
from jax.experimental import pallas as pl
from jax.experimental.pallas import tpu as pltpu

# ---- deterministic "lens / dataset" constants (module __init__ state) -------
FOCAL_LENGTH = 0.05          # f  [m]  (50mm lens)
APERTURE = 0.025             # A  [m]  (f/2)
SIGNED_COC_NORMALIZE = 1e-4  # dataset.signed_coc_normalize
COC_NORMALIZE = 1e-4         # dataset.coc_normalize
DEPTH_NORMALIZE = 10.0       # dataset.depth_normalize
_AF = APERTURE * FOCAL_LENGTH

_LANE = 128


# ------------------------------- kernels -------------------------------------
def _signed_coc_kernel(fd_ref, coc_ref, out_ref):
    # fd_ref: (B,) scalar-prefetch array in SMEM; coc_ref/out_ref: VMEM blocks.
    fd = fd_ref[pl.program_id(0)]
    numer = fd * (_AF / DEPTH_NORMALIZE)                 # per-block scalar
    slope = SIGNED_COC_NORMALIZE * (fd - FOCAL_LENGTH)   # per-block scalar
    coc = coc_ref[...].astype(jnp.float32)
    denom = _AF - coc * slope                            # 1 FMA / pixel
    out_ref[...] = (numer * pl.reciprocal(denom, approx=False)).astype(out_ref.dtype)


def _fgbg_coc_kernel(fd_ref, coc_ref, fgbg_ref, out_ref):
    fd = fd_ref[pl.program_id(0)]
    numer = fd * (_AF / DEPTH_NORMALIZE)
    slope = COC_NORMALIZE * (fd - FOCAL_LENGTH)
    coc = coc_ref[...].astype(jnp.float32)
    fgbg = fgbg_ref[...].astype(jnp.float32)
    s = coc * slope
    # af - s*(2*fgbg - 1) == (af + s) - (2*s)*fgbg   (fused sign, fewer VALU ops)
    denom = (_AF + s) - (2.0 * s) * fgbg
    out_ref[...] = (numer * pl.reciprocal(denom, approx=False)).astype(out_ref.dtype)


# ------------------------------ layout planner --------------------------------
def _sublane_align(dtype):
    # Sub-32-bit dtypes pack rows per sublane: 8 (f32) / 16 (bf16) / 32 (int8/fp8).
    return max(8, 32 // jnp.dtype(dtype).itemsize)


def _plan_layout(n_pixels, dtype, n_io, target_block_elems, vmem_budget_bytes):
    """Pick padded rows P, block rows, and tile count for a (B, P, 128) layout."""
    a = _sublane_align(dtype)
    itemsize = jnp.dtype(dtype).itemsize
    # Rows needed to cover one image, rounded up to the sublane packing unit.
    p0 = pl.cdiv(max(n_pixels, 1), _LANE)
    p0 = pl.cdiv(p0, a) * a
    # Row target from the requested block size ...
    target_rows = max(a, (target_block_elems // _LANE) // a * a)
    # ... capped so (n_io arrays) x (2 double-buffers) x block fits the VMEM budget.
    rows_cap = max(a, (vmem_budget_bytes // (n_io * 2 * _LANE * itemsize)) // a * a)
    target_rows = min(target_rows, rows_cap)
    # Tile count, then pad P so tiles divide it evenly (pad <= tiles*a rows).
    tiles = max(1, pl.cdiv(p0, target_rows))
    rows = pl.cdiv(pl.cdiv(p0, tiles), a) * a
    return tiles * rows, rows, tiles


# ------------------------------- wrapper --------------------------------------
def coc_to_depth(focus_dist, coc, fgbg=None, *,
                 target_block_elems=1024 * 1024,     # ~4 MiB f32 blocks
                 vmem_budget_bytes=24 << 20):        # double-buffered I/O budget
    """Pallas equivalent of CoCToDepth.forward.

    focus_dist: (B,) float
    coc:        (B, 1, H, W) float   (NCHW, C==1)
    fgbg:       optional (B, 1, H, W) float
    returns:    (B, 1, H, W) normalized depth (same dtype as coc)
    """
    B, C, H, W = coc.shape
    assert C == 1
    N = H * W
    n_io = 2 if fgbg is None else 3
    P, rows, tiles = _plan_layout(N, coc.dtype, n_io,
                                  target_block_elems, vmem_budget_bytes)

    def to_lane_dense(x):
        flat = x.reshape(B, N)
        pad = P * _LANE - N
        if pad:
            # Zeros keep the padded denominator at A*f (finite); padded pixels are
            # computed and then sliced away — pure layout plumbing.
            flat = jnp.pad(flat, ((0, 0), (0, pad)))
        return flat.reshape(B, P, _LANE)

    fd = focus_dist.reshape(B).astype(jnp.float32)
    inputs = [to_lane_dense(coc)]
    kernel = _signed_coc_kernel
    flops_per_px = 3
    if fgbg is not None:
        inputs.append(to_lane_dense(fgbg))
        kernel = _fgbg_coc_kernel
        flops_per_px = 5

    img_spec = pl.BlockSpec((1, rows, _LANE), lambda b, t, *_: (b, t, 0))
    itemsize = jnp.dtype(coc.dtype).itemsize
    block_bytes = rows * _LANE * itemsize
    vmem_limit = int(min(max(n_io * 2 * block_bytes + (4 << 20), 16 << 20), 48 << 20))
    total_px = B * P * _LANE
    cost = pl.CostEstimate(flops=flops_per_px * total_px,
                           transcendentals=total_px,
                           bytes_accessed=n_io * total_px * itemsize)

    out = pl.pallas_call(
        kernel,
        out_shape=jax.ShapeDtypeStruct((B, P, _LANE), coc.dtype),
        grid_spec=pltpu.PrefetchScalarGridSpec(
            num_scalar_prefetch=1,          # focus_dist -> SMEM, read via program_id
            grid=(B, tiles),
            in_specs=[img_spec] * len(inputs),
            out_specs=img_spec,
        ),
        compiler_params=pltpu.CompilerParams(
            dimension_semantics=("parallel", "parallel"),
            vmem_limit_bytes=vmem_limit),
        cost_estimate=cost,
    )(fd, *inputs)

    return out.reshape(B, P * _LANE)[:, :N].reshape(B, 1, H, W)


# ---------------------------- pure-JAX reference ------------------------------
def coc_to_depth_ref(focus_dist, coc, fgbg=None):
    fd = focus_dist.reshape(-1, 1, 1, 1).astype(jnp.float32)
    if fgbg is None:
        signed_coc_phys = coc.astype(jnp.float32) * SIGNED_COC_NORMALIZE
    else:
        signed_coc_phys = (coc.astype(jnp.float32)
                           * (2.0 * fgbg.astype(jnp.float32) - 1.0) * COC_NORMALIZE)
    depth = fd * _AF / (_AF - signed_coc_phys * (fd - FOCAL_LENGTH))
    return depth / DEPTH_NORMALIZE


if __name__ == "__main__":
    key = jax.random.PRNGKey(0)
    k1, k2, k3 = jax.random.split(key, 3)

    # --- primary small test: B=2, C=1, 16x16 (lane-dense padded path) ---------
    B, C, H, W = 2, 1, 16, 16
    focus_dist = jax.random.uniform(k1, (B,), jnp.float32, 0.3, 1.5)
    signed_coc = jax.random.uniform(k2, (B, C, H, W), jnp.float32, -1.0, 1.0)
    coc = jnp.abs(signed_coc)
    fgbg = jax.random.uniform(k3, (B, C, H, W), jnp.float32, 0.0, 1.0)

    depth_signed = jax.block_until_ready(coc_to_depth(focus_dist, signed_coc))
    depth_fgbg = jax.block_until_ready(coc_to_depth(focus_dist, coc, fgbg))
    assert depth_signed.shape == (B, 1, H, W)
    assert depth_fgbg.shape == (B, 1, H, W)
    assert jnp.allclose(depth_signed, coc_to_depth_ref(focus_dist, signed_coc),
                        rtol=1e-5, atol=1e-6)
    assert jnp.allclose(depth_fgbg, coc_to_depth_ref(focus_dist, coc, fgbg),
                        rtol=1e-5, atol=1e-6)

    # --- multi-tile path (2-D grid over batch x pixel tiles) ------------------
    H2, W2 = 32, 64                    # H*W = 2048 -> P = 16 rows of 128
    sc2 = jax.random.uniform(k2, (B, C, H2, W2), jnp.float32, -1.0, 1.0)
    fg2 = jax.random.uniform(k3, (B, C, H2, W2), jnp.float32, 0.0, 1.0)
    d2 = jax.block_until_ready(
        coc_to_depth(focus_dist, jnp.abs(sc2), fg2, target_block_elems=1024))
    assert jnp.allclose(d2, coc_to_depth_ref(focus_dist, jnp.abs(sc2), fg2),
                        rtol=1e-5, atol=1e-6)

    # --- awkward spatial size (H*W not a multiple of 128 -> wrapper padding) ---
    H3, W3 = 10, 10
    sc3 = jax.random.uniform(k2, (B, C, H3, W3), jnp.float32, -1.0, 1.0)
    d3 = jax.block_until_ready(coc_to_depth(focus_dist, sc3))
    assert jnp.allclose(d3, coc_to_depth_ref(focus_dist, sc3),
                        rtol=1e-5, atol=1e-6)

    # --- bf16 input (exercises dtype-aware 16-row sublane alignment) ----------
    sc4 = signed_coc.astype(jnp.bfloat16)
    d4 = jax.block_until_ready(coc_to_depth(focus_dist, sc4))
    ref4 = coc_to_depth_ref(focus_dist, sc4.astype(jnp.float32)).astype(jnp.bfloat16)
    assert d4.dtype == jnp.bfloat16
    assert jnp.allclose(d4.astype(jnp.float32), ref4.astype(jnp.float32),
                        rtol=2e-2, atol=2e-3)

    print("KERNEL_OK")
</pallas_src>

<mosaic_0001>
module attributes {stable_mosaic.version = 11 : i64} {
  func.func @_signed_coc_kernel(%arg0: i32, %arg1: i32, %arg2: memref<2xf32, #tpu.memory_space<smem>>, %arg3: memref<1x8x128xf32, #tpu.memory_space<vmem>>, %arg4: memref<1x8x128xf32, #tpu.memory_space<vmem>>) attributes {dimension_semantics = [#tpu.dimension_semantics<parallel>, #tpu.dimension_semantics<parallel>], iteration_bounds = array<i64: 2, 1>, scalar_prefetch = 1 : i64, scratch_operands = 0 : i64, tpu.core_type = #tpu.core_type<tc>, window_params = [{transform_indices = @transform_0, window_bounds = array<i64: 1, 8, 128>}, {transform_indices = @transform_1, window_bounds = array<i64: 1, 8, 128>}]} {
    %0 = arith.index_cast %arg0 : i32 to index
    %1 = memref.load %arg2[%0] : memref<2xf32, #tpu.memory_space<smem>>
    %cst = arith.constant 1.250000e-04 : f32
    %2 = arith.mulf %1, %cst : f32
    %cst_0 = arith.constant 5.000000e-02 : f32
    %3 = arith.subf %1, %cst_0 : f32
    %cst_1 = arith.constant 9.99999974E-5 : f32
    %4 = arith.mulf %cst_1, %3 : f32
    %c0 = arith.constant 0 : index
    %c0_2 = arith.constant 0 : index
    %c0_3 = arith.constant 0 : index
    %5 = vector.load %arg3[%c0, %c0_2, %c0_3] : memref<1x8x128xf32, #tpu.memory_space<vmem>>, vector<1x8x128xf32>
    %6 = vector.broadcast %4 : f32 to vector<1x8x128xf32>
    %7 = arith.mulf %5, %6 : vector<1x8x128xf32>
    %cst_4 = arith.constant 1.250000e-03 : f32
    %8 = vector.broadcast %cst_4 : f32 to vector<1x8x128xf32>
    %9 = arith.subf %8, %7 : vector<1x8x128xf32>
    %10 = tpu.reciprocal %9 : vector<1x8x128xf32> -> vector<1x8x128xf32>
    %11 = vector.broadcast %2 : f32 to vector<1x8x128xf32>
    %12 = arith.mulf %11, %10 : vector<1x8x128xf32>
    %c0_5 = arith.constant 0 : index
    %c0_6 = arith.constant 0 : index
    %c0_7 = arith.constant 0 : index
    %13 = vector.load %arg4[%c0_5, %c0_6, %c0_7] : memref<1x8x128xf32, #tpu.memory_space<vmem>>, vector<1x8x128xf32>
    tpu.vector_store %arg4[%c0_5, %c0_6, %c0_7], %12 {strides = array<i32>} : memref<1x8x128xf32, #tpu.memory_space<vmem>>, vector<1x8x128xf32>,
    return
  }
  func.func @transform_0(%arg0: i32, %arg1: i32, %arg2: memref<2xf32, #tpu.memory_space<smem>>) -> (i32, i32, i32) {
    %c0_i32 = arith.constant 0 : i32
    %c0_i32_0 = arith.constant 0 : i32
    return %arg0, %arg1, %c0_i32 : i32, i32, i32
  }
  func.func @transform_1(%arg0: i32, %arg1: i32, %arg2: memref<2xf32, #tpu.memory_space<smem>>) -> (i32, i32, i32) {
    %c0_i32 = arith.constant 0 : i32
    %c0_i32_0 = arith.constant 0 : i32
    return %arg0, %arg1, %c0_i32 : i32, i32, i32
  }
}

</mosaic_0001>

<bundles_post_ra>
// kernel: tpu_custom_call.1
= control target key start
LH: loop header
LB: loop body
LE: loop exit
PB: predicated region body
PF: predicated region fallthrough
CT: control target
= control target key end

     0   :  { %s489_s12 = smov [#allocation3]   ;;  %s629_s0 = inlined_call_operand.hbm [shape: f32[2], index: 0, kind: input, shape index: {}]   ;;  %s630_s1 = inlined_call_operand.hbm [shape: f32[2,8,128], index: 1, kind: input, shape index: {}]   ;;  %s631_s2 = inlined_call_operand.hbm [shape: f32[2,8,128], index: 2, kind: output, shape index: {}]  }
   0x1   :  { %s8_s11 = sshll.u32 %s629_s0, 4  ;;  %s9_s11 = int_to_ptr.hbm [resolvable:$true] %s8_s11 }
   0x2   :  { %11 = dma.hbm_to_smem %s9_s11, 16, %s489_s12, [#allocation2] }
   0x3   :  { %455 = dma.done.wait [#allocation2], 16 }
   0x4   :  { %456 = vsyncadd [#allocation2], 4294967280 }
   0x5   :  { %14 = sfence }
   0x6   :  { %15 = vsyncpa [#allocation5], 0 }
   0x7   :  { %17 = vsyncpa [#allocation5 + $0x1], 0 }
   0x8   :  { %18 = vsyncpa [#allocation6], 0 }
   0x9   :  { %20 = vsyncpa [#allocation6 + $0x1], 0  ;;  %s508_s13 = smov 0   ;;  %s510_s14 = smov 0  }
   0xa   :  { %s512_s15 = smov 0   ;;  %s514_s16 = smov 0  }
   0xb   :  { %s516_s17 = smov 0   ;;  %s518_s0 = smov 0  }
   0xc LB: > { %s282_s18 = sadd.s32 4294967295, %s487_s0   ;;  %s283_s19 = sadd.s32 4294967294, %s487_s0   ;;  %s487_s0 = sphi %s518_s0, %s26_s0   ;;  %s483_s17 = sphi %s516_s17, %s640_s17   ;;  %s479_s16 = sphi %s514_s16, %s639_s16   ;;  %s475_s15 = sphi %s512_s15, %s638_s15   ;;  %s471_s14 = sphi %s510_s14, %s637_s14   ;;  %s467_s13 = sphi %s508_s13, %s636_s13  }
   0xd   : > { %s38_s20 = sadd.s32 1, %s483_s17  ;;  %s47_s21 = sadd.s32 1, %s475_s15 }
   0xe   : > { %p40_p0 = scmp.ge.s32.totalorder %s38_s20, 2  ;;  %p54_p1 = scmp.ne.s32.totalorder %s475_s15, %s471_s14 }
   0xf   : > { %p55_p2 = scmp.eq.s32.totalorder %s487_s0, 0  ;;  %p60_p3 = scmp.ne.s32.totalorder %s471_s14, %s467_s13 }
  0x10   : > { %s642_s20 = smov (%p40_p0, %s38_s20), 0  ;;  %p61_p5 = scmp.eq.s32.totalorder %s282_s18, 0 }
  0x11   : > { %p549_p4 = por %p55_p2, %p54_p1  ;;  %s42_s23 = ssub.s32 %s483_s17, %s642_s20 }
  0x12   : > { %p86_p6 = scmp.eq.s32.totalorder %s282_s18, 1  ;;  %p45_p7 = scmp.eq.s32.totalorder %s42_s23, 0 }
  0x13   : > { %p555_p8 = por %p61_p5, %p60_p3  ;;  %p92_p10 = scmp.eq.s32.totalorder %s283_s19, 1 }
  0x14   : > { %p559_p9 = por %p86_p6, %p54_p1  ;;  %p285_p12 = scmp.ge.s32.totalorder %s487_s0, 2 }
  0x15   : > { %s564_s26 = scalar_select %p45_p7, %s475_s15, %s47_s21  }
  0x16   : > { %p566_p11 = por %p92_p10, %p60_p3  ;;  %p308_p13 = scmp.lt.s32.totalorder %s487_s0, 2 }
  0x17   : > { %s112_s28 = sand.u32 1, %s475_s15   ;;  %s287_s30 = sshll.u32 %s483_s17, 3 }
  0x18   : > { %s286_s29 = sshll.u32 %s112_s28, 3  ;;  %s121_s5 = scalar_lea.hbm %s630_s1, %s287_s30 }
  0x19   : > { %s116_s6 = scalar_lea.vmem [#allocation4], %s286_s29  ;;  %s123_s8 = sshll.u32 %s121_s5, 4  ;;  %s124_s8 = int_to_ptr.hbm [resolvable:$true] %s123_s8 }
  0x1a   : > { %s125_s7 = sshll.u32 %s116_s6, 4  ;;  %p301_p0 = pnand %p308_p13, %p549_p4  ;;  %s126_s7 = int_to_ptr.vmem [resolvable:$true] %s125_s7 }
  0x1b   : > { %p288_p1 = scmp.ge.s32.totalorder %s487_s0, 1  ;;  %p130_p2 = scmp.lt.s32.totalorder %s487_s0, 3 }
  0x1c   : > { %s113_s9 = scalar_lea.sflag [#allocation5], %s112_s28 }
  0x1d   : > { %303 = dma.hbm_to_vmem [thread:$0]  (!%p301_p0), %s124_s8, 128, %s126_s7, %s113_s9  }
  0x1e   : > { %p131_p3 = pnand %p288_p1, %p130_p2 }
  0x1f   : > { %s582_s10 = sand.u32 (!%p131_p3), 1, %s471_s14  }
  0x20   : > { %134 = sbr.rel (%p131_p3) target bundleno = 75 (0x4b), region = 24  ;;  %s289_s11 = sshll.u32 (!%p131_p3), %s582_s10, 3 }
  0x21   : > { %s137_s12 = scalar_lea.sflag (!%p131_p3), [#allocation5], %s582_s10  ;;  %s140_s18 = scalar_lea.vmem (!%p131_p3), [#allocation4], %s289_s11 }
  0x25   : > { %458 = dma.done.wait (%p555_p8), %s137_s12, 128  }
  0x26   : > { %460 = vsyncadd (%p555_p8), %s137_s12, 4294967168  ;;  %s160_s19 = sld [smem:[#allocation3 + %s479_s16]]  ;;  %v164_v0 = vld [vmem:[%s140_s18] sm:$0xff]  ;;  %s293_s23 = sshll.u32 %s479_s16, 3 }
  0x27   : > { %s197_s30 = scalar_lea.hbm %s631_s2, %s293_s23  ;;  %s159_s3 = scalar_lea.vmem [#allocation7], %s289_s11 }
  0x28   : > { %s199_s4 = sshll.u32 %s159_s3, 4  ;;  %s201_s16 = sshll.u32 %s197_s30, 4  ;;  %s200_s4 = int_to_ptr.vmem [resolvable:$true] %s199_s4  ;;  %s202_s16 = int_to_ptr.hbm [resolvable:$true] %s201_s16 }
  0x29   : > { %s186_s5 = scalar_lea.sflag [#allocation6], %s582_s10  ;;  %s417_s6 = sshra.s32 %s202_s16, 4  ;;  %s418_s6 = int_to_ptr.hbm [resolvable:$true] %s417_s6 }
  0x2a   : > { %s419_s7 = scalar_lea.hbm %s418_s6, 8  ;;  %s423_s11 = scalar_lea.hbm %s631_s2, 16 }
  0x2b   : > { %p420_p4 = scmp.ne.s32.totalorder %s418_s6, %s419_s7  ;;  %p424_p7 = scmp.lt.s32.totalorder %s418_s6, %s631_s2 }
  0x2c   : > { %s291_s21 = sadd.f32 -0.05, %s160_s19  ;;  %s161_s24 = smul.f32 0.000125, %s160_s19 }
  0x2d   : > { %p421_p5 = pnand %p420_p4, %p559_p9  ;;  %p425_p8 = scmp.lt.s32.totalorder %s423_s11, %s419_s7 }
  0x2e   : > { %s163_s22 = smul.f32 0.0001, %s291_s21  ;;  %v182_v12 = vstv %s161_s24 }
  0x2f   : > { %p422_p6 = pneg %p421_p5  ;;  %p426_p10 = por %p425_p8, %p424_p7 }
  0x30   : > { %v165_v1 = vstv %s163_s22 }
  0x31   : > { %v166_v2 = vmul.f32 %v165_v1, %v164_v0  ;;  %p427_p13 = pnand %p426_p10, %p422_p6 }
  0x33   : > { %v167_v3 = vsub.f32 0.00125, %v166_v2 }
  0x35   : > { %359 = vrcp.f32 %v167_v3  ;;  %v179_v6 = vand.u32 2147483648, %v167_v3  ;;  %vm173_vm0 = vweird.f32 %v167_v3  ;;  %v177_v8 = vand.u32 2147483647, %v167_v3 }
  0x37   : > { %v180_v10 = vor.u32 1.1754944e-38, %v179_v6  ;;  %vm178_vm3 = vcmp.eq.f32.partialorder %v177_v8, 8.507059e+37 }
  0x3b   : > { %v360_v4 = vpop.eup %359 }
  0x3c   : > { %v169_v5 = vmul.f32 %v360_v4, %v167_v3  ;;  %vm174_vm1 = vweird.f32 %v360_v4 }
  0x3d   : > { %vm175_vm2 = vmor %vm173_vm0, %vm174_vm1 }
  0x3e   : > { %v170_v7 = vsub.f32 1.0, %v169_v5 }
  0x40   : > { %v171_v9 = vmul.f32 %v360_v4, %v170_v7 }
  0x42   : > { %v172_v11 = vadd.f32 %v360_v4, %v171_v9 }
  0x44   : > { %v176_v13 = vsel %vm175_vm2, %v360_v4, %v172_v11 }
  0x45   : > { %v181_v14 = vsel %vm178_vm3, %v180_v10, %v176_v13 }
  0x46   : > { %v183_v15 = vmul.f32 %v182_v12, %v181_v14 }
  0x48   : > { %184 = vst [vmem:[%s159_s3] sm:$0xff] %v183_v15 }
  0x49   : > { %430 = shalt.err (!%p427_p13)
}
  0x4a   : > { %298 = dma.vmem_to_hbm [thread:$0]  (%p559_p9), %s200_s4, 128, %s202_s16, %s186_s5  }
  0x4b PF: > { %s213_s10 = sand.u32 1, %s467_s13   ;;  %p305_p0 = pnand %p285_p12, %p566_p11 }
  0x4c   : > { %s214_s19 = scalar_lea.sflag [#allocation6], %s213_s10 }
  0x4d   : > { %p306_p1 = pneg %p305_p0 }
  0x4f   : > { %462 = dma.done.wait (%p306_p1), %s214_s19, 128  }
  0x50   : > { %464 = vsyncadd (%p306_p1), %s214_s19, 4294967168  ;;  %s26_s0 = sadd.s32 1, %s487_s0   ;;  %s636_s13 = smov %s471_s14 }
  0x51   : > { %p23_p2 = scmp.ge.s32.totalorder %s26_s0, 4   ;;  %s637_s14 = smov %s475_s15 }
  0x52   : > { %s638_s15 = smov %s564_s26  ;;  %s639_s16 = smov %s483_s17 }
  0x53   : > { %s640_s17 = smov %s642_s20  ;;  %25 = sbr.rel (!%p23_p2) target bundleno = 12 (0xc), region = 69 }
  0x58   :  { %220 = vsyncpa [#allocation5], 1 }
  0x59   :  { %222 = vsyncpa [#allocation5 + $0x1], 1 }
  0x5a   :  { %223 = vsyncpa [#allocation6], 1 }
  0x5b   :  { %225 = vsyncpa [#allocation6 + $0x1], 1 }

</bundles_post_ra>
